<compile_context>
chip_gen: v7x
topology: tpu7x:2x2x1
jax: 0.10.0
libtpu: 0.0.40
codegen_flags: <defaults>
</compile_context>

<pallas_src>
import functools

import jax
import jax.numpy as jnp
from jax.experimental import pallas as pl
from jax.experimental.pallas import tpu as pltpu


def _round_up(x, m):
    return ((x + m - 1) // m) * m


# --------------------------------------------------------------------------
# Hot path for reduction in {'mean', 'sum'}:
# column sums over the batch dimension of the D-concatenated features.
# Each grid step handles one independent (B, tk) tile and writes one
# independent (1, tk) lane-dense output block -> no scratch, 'parallel' axis.
# --------------------------------------------------------------------------
def _colsum_kernel(x_ref, o_ref):
    x = x_ref[...].astype(jnp.float32)           # f32 accumulation of the row-sum
    o_ref[...] = jnp.sum(x, axis=0, keepdims=True)


@functools.partial(jax.jit, static_argnames=("tk",))
def column_sums(feat, *, tk=512):
    """Per-column sums over rows of feat [B, D] (D must be a multiple of tk).

    Returns a float32 vector of shape [D].
    """
    B, D = feat.shape
    assert D % tk == 0, "caller pads D to a multiple of tk"
    out = pl.pallas_call(
        _colsum_kernel,
        out_shape=jax.ShapeDtypeStruct((1, D), jnp.float32),
        grid_spec=pltpu.PrefetchScalarGridSpec(
            num_scalar_prefetch=0,
            grid=(D // tk,),
            in_specs=[pl.BlockSpec((B, tk), lambda k: (0, k))],
            out_specs=pl.BlockSpec((1, tk), lambda k: (0, k)),
        ),
        compiler_params=pltpu.CompilerParams(
            dimension_semantics=("parallel",),    # independent output blocks
        ),
        cost_estimate=pl.CostEstimate(
            flops=int(B) * int(D),
            transcendentals=0,
            bytes_accessed=int(B) * int(D) * feat.dtype.itemsize + int(D) * 4,
        ),
    )(feat)
    return out[0]


# --------------------------------------------------------------------------
# reduction='none' path: full BxB Gram per layer on the MXU.
# dot_general contracts axis 1 of both operands (no materialized transpose);
# inputs stay in native dtype, accumulation is f32.
# --------------------------------------------------------------------------
def _gram_kernel(x_ref, o_ref, acc_ref):
    k = pl.program_id(0)

    @pl.when(k == 0)
    def _():
        acc_ref[...] = jnp.zeros_like(acc_ref)

    x = x_ref[...]
    acc_ref[...] += jax.lax.dot_general(
        x, x,
        dimension_numbers=(((1,), (1,)), ((), ())),
        preferred_element_type=jnp.float32,
    )

    @pl.when(k == pl.num_programs(0) - 1)
    def _():
        o_ref[...] = acc_ref[...].astype(o_ref.dtype)


@functools.partial(jax.jit, static_argnames=("tk",))
def gram_full(feat, *, tk=512):
    """feat @ feat.T as a [B, B] float32 matrix (Pallas MXU kernel)."""
    B, D = feat.shape
    pad = (-D) % tk
    if pad:
        feat = jnp.pad(feat, ((0, 0), (0, pad)))   # zero cols do not change Gram
    Dp = D + pad
    out = pl.pallas_call(
        _gram_kernel,
        out_shape=jax.ShapeDtypeStruct((B, B), jnp.float32),
        grid_spec=pltpu.PrefetchScalarGridSpec(
            num_scalar_prefetch=0,
            grid=(Dp // tk,),
            in_specs=[pl.BlockSpec((B, tk), lambda k: (0, k))],
            out_specs=pl.BlockSpec((B, B), lambda k: (0, 0)),
            scratch_shapes=[pltpu.VMEM((B, B), jnp.float32)],
        ),
        compiler_params=pltpu.CompilerParams(
            dimension_semantics=("arbitrary",),    # K reduction axis
        ),
        cost_estimate=pl.CostEstimate(
            flops=2 * int(B) * int(B) * int(Dp),
            transcendentals=0,
            bytes_accessed=int(B) * int(Dp) * feat.dtype.itemsize + int(B) * int(B) * 4,
        ),
    )(feat)
    return out


# --------------------------------------------------------------------------
# ModelLayersKernel.forward equivalent.
# --------------------------------------------------------------------------
def model_layers_kernel_forward(params, feats, pred, track, reduction="mean",
                                max_tk=512):
    """JAX/Pallas equivalent of ModelLayersKernel.forward with:
       - layer_kernel   : linear (Gram) kernel per layer
       - layer_weighting: uniform (1 / num_layers)
       - reduction      : 'mean' | 'sum' | 'none'/None
    feats: OrderedDict-like mapping layer_name -> [B, D_l] flattened features.
    """
    total = len(feats)
    if total == 0:
        return None

    feat_layers = list(feats.values())
    layer_track = [dict() for _ in range(total)]
    weight = 1.0 / float(total)                    # uniform LayerWeighting

    if reduction in ("mean", "sum"):
        B = feat_layers[0].shape[0]
        dims = [int(f.shape[1]) for f in feat_layers]
        d_total = sum(dims)

        # One fused launch over the D-concatenated features.  Lane tile is a
        # multiple of 128; padding columns are zero (contribute nothing).
        tk = max(128, min(max_tk, _round_up(d_total, 128)))
        d_pad = _round_up(d_total, tk)

        common_dtype = jnp.result_type(*[f.dtype for f in feat_layers])
        parts = [f.astype(common_dtype) for f in feat_layers]
        if d_pad > d_total:
            parts.append(jnp.zeros((B, d_pad - d_total), common_dtype))
        feat_cat = jnp.concatenate(parts, axis=1)

        colsum = column_sums(feat_cat, tk=tk)      # [d_pad] float32
        sq = colsum * colsum

        # Per-layer values via static segment sums (mean(F F^T) identity).
        gram = None
        off = 0
        for index, d in enumerate(dims):
            seg = jnp.sum(sq[off:off + d])
            reduced = seg / float(B * B) if reduction == "mean" else seg
            layer_track[index]["reduced"] = reduced
            contrib = weight * reduced
            gram = contrib if gram is None else gram + contrib
            off += d

        track["layer_track"] = layer_track
        return gram

    # reduction is 'none'/None: weighted sum of full BxB Gram matrices.
    gram = None
    for index, f in enumerate(feat_layers):
        k_full = gram_full(f)
        layer_track[index]["kernel"] = k_full
        contrib = weight * k_full
        gram = contrib if gram is None else gram + contrib

    track["layer_track"] = layer_track
    return gram


# ----------------------------- reference (pure JAX) ------------------------
def _reference_forward(feats, reduction="mean"):
    total = len(feats)
    weight = 1.0 / total
    out = None
    for f in feats.values():
        g = jnp.dot(f.astype(jnp.float32), f.astype(jnp.float32).T)
        if reduction == "mean":
            v = jnp.mean(g)
        elif reduction == "sum":
            v = jnp.sum(g)
        else:
            v = g
        contrib = weight * v
        out = contrib if out is None else out + contrib
    return out


if __name__ == "__main__":
    key = jax.random.PRNGKey(0)
    B = 8
    layer_dims = [32, 64, 128]                    # flattened feature widths

    feats = {}
    for i, d in enumerate(layer_dims):
        key, sub = jax.random.split(key)
        feats[f"layer_{i}"] = jax.random.normal(sub, (B, d), dtype=jnp.float32)

    # mean reduction (default / hot path)
    track = {}
    out = model_layers_kernel_forward(None, feats, None, track, reduction="mean")
    out = jax.block_until_ready(out)
    ref = _reference_forward(feats, "mean")
    assert jnp.allclose(out, ref, rtol=1e-4, atol=1e-4), (out, ref)

    # sum reduction
    track_s = {}
    out_s = model_layers_kernel_forward(None, feats, None, track_s, reduction="sum")
    out_s = jax.block_until_ready(out_s)
    ref_s = _reference_forward(feats, "sum")
    assert jnp.allclose(out_s, ref_s, rtol=1e-4, atol=1e-3), (out_s, ref_s)

    # none reduction (full BxB weighted Gram)
    track_n = {}
    out_n = model_layers_kernel_forward(None, feats, None, track_n, reduction="none")
    out_n = jax.block_until_ready(out_n)
    ref_n = _reference_forward(feats, "none")
    assert jnp.allclose(out_n, ref_n, rtol=1e-4, atol=1e-3)

    print("KERNEL_OK")
</pallas_src>

<mosaic_0001>
module attributes {stable_mosaic.version = 11 : i64} {
  func.func @_colsum_kernel(%arg0: i32, %arg1: memref<8x256xf32, #tpu.memory_space<vmem>>, %arg2: memref<1x256xf32, #tpu.memory_space<vmem>>) attributes {dimension_semantics = [#tpu.dimension_semantics<parallel>], iteration_bounds = array<i64: 1>, scalar_prefetch = 0 : i64, scratch_operands = 0 : i64, tpu.core_type = #tpu.core_type<tc>, window_params = [{transform_indices = @transform_0, window_bounds = array<i64: 8, 256>}, {transform_indices = @transform_1, window_bounds = array<i64: 1, 256>}]} {
    %c0 = arith.constant 0 : index
    %c0_0 = arith.constant 0 : index
    %0 = vector.load %arg1[%c0, %c0_0] : memref<8x256xf32, #tpu.memory_space<vmem>>, vector<8x256xf32>
    %cst = arith.constant dense<0.000000e+00> : vector<256xf32>
    %1 = vector.multi_reduction <add>, %0, %cst [0] : vector<8x256xf32> to vector<256xf32>
    %2 = vector.shape_cast %1 : vector<256xf32> to vector<1x256xf32>
    %c0_1 = arith.constant 0 : index
    %c0_2 = arith.constant 0 : index
    %3 = vector.load %arg2[%c0_1, %c0_2] : memref<1x256xf32, #tpu.memory_space<vmem>>, vector<1x256xf32>
    tpu.vector_store %arg2[%c0_1, %c0_2], %2 {strides = array<i32>} : memref<1x256xf32, #tpu.memory_space<vmem>>, vector<1x256xf32>,
    return
  }
  func.func @transform_0(%arg0: i32) -> (i32, i32) {
    %c0_i32 = arith.constant 0 : i32
    %c0_i32_0 = arith.constant 0 : i32
    return %c0_i32, %arg0 : i32, i32
  }
  func.func @transform_1(%arg0: i32) -> (i32, i32) {
    %c0_i32 = arith.constant 0 : i32
    %c0_i32_0 = arith.constant 0 : i32
    return %c0_i32, %arg0 : i32, i32
  }
}

</mosaic_0001>

<bundles_post_ra>
// kernel: column_sums.1
= control target key start
LH: loop header
LB: loop body
LE: loop exit
PB: predicated region body
PF: predicated region fallthrough
CT: control target
= control target key end

     0   :  { %6 = vsyncpa [#allocation3], 0  ;;  %s161_s0 = inlined_call_operand.hbm [shape: f32[8,256], index: 0, kind: input, shape index: {}]   ;;  %s162_s1 = inlined_call_operand.hbm [shape: f32[1,256], index: 1, kind: output, shape index: {}]  }
   0x1   :  { %7 = vsyncpa [#allocation4], 0  ;;  %s124_s6 = smov [#allocation2]   ;;  %s76_s10 = scalar_lea.hbm %s161_s0, 256 }
   0x2   :  { %s14_s7 = sshll.u32 %s124_s6, 4  ;;  %p77_p0 = scmp.ne.s32.totalorder %s161_s0, %s76_s10  ;;  %s15_s7 = int_to_ptr.vmem [resolvable:$true] %s14_s7 }
   0x3   :  { %p80_p1 = scmp.lt.u32.totalorder %s76_s10, %s161_s0 }
   0x5   :  { %p82_p2 = pnand %p80_p1, %p77_p0 }
   0x7   :  { %85 = shalt.err (!%p82_p2)
}
   0x8   :  { %s86_s15 = scalar_lea.vmem %s15_s7, 256  ;;  %p91_p4 = scmp.lt.s32.totalorder %s15_s7, %s15_s7 }
   0x9   :  { %p87_p3 = scmp.ne.s32.totalorder %s15_s7, %s86_s15  ;;  %p92_p5 = scmp.lt.s32.totalorder %s86_s15, %s86_s15 }
   0xb   :  { %p93_p6 = por %p92_p5, %p91_p4 }
   0xd   :  { %p94_p7 = pnand %p93_p6, %p87_p3 }
   0xf   :  { %97 = shalt.err (!%p94_p7)
}
  0x10   :  { %17 = dma.hbm_to_vmem [thread:$0]  %s161_s0, 256, %s15_s7, [#allocation3]  }
  0x11   :  { %120 = dma.done.wait [#allocation3], 256  }
  0x12   :  { %121 = vsyncadd [#allocation3], 4294967040  ;;  %v21_v0 = vld [vmem:[#allocation2] sm:$0xff]  ;;  %v22_v1 = vld [vmem:[#allocation2 + $0x8] sm:$0xff]  ;;  %v125_v6 = vmov 1966171168   ;;  %v41_v8 = vlaneseq }
  0x13   :  { %v23_v2 = vrot.slane %v21_v0, 4  ;;  %v29_v3 = vrot.slane %v22_v1, 4  ;;  %v39_v7 = vunpack.c.l.s4 %v125_v6  ;;  %s126_s0 = smov [#allocation5]  }
  0x14   :  { %v42_v14 = vshrl.u32 %v41_v8, 7  ;;  %s64_s18 = sshll.u32 %s126_s0, 4  ;;  %vm55_vm0 = vcmp.lt.s32.totalorder %v41_v8, 256  ;;  %s65_s18 = int_to_ptr.vmem [resolvable:$true] %s64_s18 }
  0x15   :  { %v24_v4 = vadd.f32 %v23_v2, %v21_v0  ;;  %v30_v5 = vadd.f32 %v29_v3, %v22_v1  ;;  %v40_v13 = vunpack.c.0.s8 %v39_v7  ;;  %s98_s19 = scalar_lea.vmem %s65_s18, 32  ;;  %p103_p9 = scmp.lt.s32.totalorder %s65_s18, %s65_s18 }
  0x16   :  { %p99_p8 = scmp.ne.s32.totalorder %s65_s18, %s98_s19  ;;  %p104_p10 = scmp.lt.s32.totalorder %s98_s19, %s98_s19 }
  0x17   :  { %v25_v9 = vrot.slane %v24_v4, 2  ;;  %v31_v10 = vrot.slane %v30_v5, 2  ;;  %v43_v19 = vsub.s32 %v40_v13, %v42_v14 }
  0x18   :  { %p105_p11 = por %p104_p10, %p103_p9 }
  0x19   :  { %v26_v11 = vadd.f32 %v25_v9, %v24_v4  ;;  %v32_v12 = vadd.f32 %v31_v10, %v30_v5 }
  0x1a   :  { %p106_p12 = pnand %p105_p11, %p99_p8 }
  0x1b   :  { %v27_v15 = vrot.slane %v26_v11, 1  ;;  %v33_v16 = vrot.slane %v32_v12, 1 }
  0x1d   :  { %v28_v17 = vadd.f32 %v27_v15, %v26_v11  ;;  %v34_v18 = vadd.f32 %v33_v16, %v32_v12 }
  0x1f   :  { %v37_v20 = vcombine.low %v28_v17, %v34_v18 }
  0x21   :  { %v44_v21 = vrot.slane %v37_v20, %v43_v19 }
  0x23   :  { %v51_v22 = vrot.slane %v44_v21, %v43_v19 }
  0x25   :  { %57 = vst.msk [vmem:[#allocation5] sm:$0x3] %vm55_vm0, %v51_v22 }
  0x26   :  { %109 = shalt.err (!%p106_p12)
}
  0x27   :  { %s110_s22 = scalar_lea.hbm %s162_s1, 32 }
  0x28   :  { %p111_p13 = scmp.ne.s32.totalorder %s162_s1, %s110_s22  ;;  %p114_p0 = scmp.lt.u32.totalorder %s110_s22, %s162_s1 }
  0x2a   :  { %p116_p1 = pnand %p114_p0, %p111_p13 }
  0x2c   :  { %119 = shalt.err (!%p116_p1)
}
  0x2d   :  { %67 = dma.vmem_to_hbm [thread:$0]  %s65_s18, 32, %s162_s1, [#allocation4]  }
  0x2e   :  { %122 = dma.done.wait [#allocation4], 32  }
  0x2f   :  { %123 = vsyncadd [#allocation4], 4294967264 }
  0x30   :  { %71 = vsyncpa [#allocation3], 1 }
  0x31   :  { %72 = vsyncpa [#allocation4], 1 }

</bundles_post_ra>
